<compile_context>
chip_gen: v7x
topology: tpu7x:2x2x1
jax: 0.10.0
libtpu: 0.0.40
codegen_flags: <defaults>
</compile_context>

<pallas_src>
import functools

import jax
import jax.numpy as jnp
from jax import lax
from jax.experimental import pallas as pl
from jax.experimental.pallas import tpu as pltpu

EPS = 1e-5


def _bn_rows(h, gamma, beta):
    """BatchNorm1d(num_features=N) on the flat (N, B*C) layout.

    Training-mode batch statistics per node row over (batch, feature), fused into a
    single sum / sum-of-squares pass with one rsqrt per node.
    """
    inv_n = 1.0 / float(h.shape[1])
    mean = jnp.sum(h, axis=1, keepdims=True) * inv_n           # (N, 1)
    mean_sq = jnp.sum(h * h, axis=1, keepdims=True) * inv_n    # (N, 1)
    var = jnp.maximum(mean_sq - mean * mean, 0.0)              # biased (training-mode) var
    scale = gamma * lax.rsqrt(var + EPS)                       # (N, 1)
    shift = beta - mean * scale
    return h * scale + shift


def classifier_kernel(
    a_hat_ref, xg_ref,
    w1_ref, b1_ref, gam1_ref, bet1_ref,
    w2_ref, b2_ref, gam2_ref, bet2_ref,
    xf_ref, wl1_ref, bl1_ref, wl2_ref, bl2_ref,
    wfc_g_ref, wfc_f_ref, bfc_ref,
    out_ref,
    *, batch,
):
    f32 = jnp.float32
    bf16 = jnp.bfloat16

    a_hat = a_hat_ref[...]                 # (N, N)      bf16
    xg = xg_ref[...]                       # (N, B*67)   bf16

    # ---- GCN layer 1:  A_hat @ (X W1) + b1   (two single 2-D MXU matmuls) ----
    xw1 = jnp.dot(xg, w1_ref[...], preferred_element_type=f32)           # (N, B*64)
    h1 = jnp.dot(a_hat, xw1.astype(bf16), preferred_element_type=f32)    # (N, B*64)
    h1 = h1 + b1_ref[...]
    h1 = _bn_rows(h1, gam1_ref[...], bet1_ref[...])
    h1 = jnp.maximum(h1, 0.0)

    # ---- GCN layer 2 ----
    xw2 = jnp.dot(h1.astype(bf16), w2_ref[...], preferred_element_type=f32)   # (N, B*32)
    h2 = jnp.dot(a_hat, xw2.astype(bf16), preferred_element_type=f32)         # (N, B*32)
    h2 = h2 + b2_ref[...]
    h2 = _bn_rows(h2, gam2_ref[...], bet2_ref[...])
    h2 = jnp.maximum(h2, 0.0)

    # ---- global_max_pool over the node axis, then unflatten (1, B*32) -> (B, 32) ----
    pooled = jnp.max(h2, axis=0, keepdims=True)                 # (1, B*32)
    feat = pooled.shape[1] // batch
    x_pool = jnp.concatenate(
        [pooled[:, b * feat:(b + 1) * feat] for b in range(batch)], axis=0)   # (B, 32)

    # ---- fingerprint / descriptor path ----
    f1 = jnp.dot(xf_ref[...], wl1_ref[...], preferred_element_type=f32) + bl1_ref[...]
    f1 = jnp.maximum(f1, 0.0)                                   # (B, 400)
    f2 = jnp.dot(f1.astype(bf16), wl2_ref[...], preferred_element_type=f32) + bl2_ref[...]
    f2 = jnp.maximum(f2, 0.0)                                   # (B, 64)

    # ---- concat -> fc (realized as split matmul) -> softmax ----
    logits = (jnp.dot(x_pool.astype(bf16), wfc_g_ref[...], preferred_element_type=f32)
              + jnp.dot(f2.astype(bf16), wfc_f_ref[...], preferred_element_type=f32)
              + bfc_ref[...])                                   # (B, O)
    m = jnp.max(logits, axis=1, keepdims=True)
    e = jnp.exp(logits - m)
    denom = jnp.sum(e, axis=1, keepdims=True)
    out_ref[...] = e * pl.reciprocal(denom, approx=True)


# ----------------------------------------------------------------------------------
# Hoisted / cacheable preprocessing (plain JAX glue, runs once per model / edge list)
# ----------------------------------------------------------------------------------

def build_normalized_adjacency(edge_list, n_nodes):
    """GCN normalization A_hat = D^-1/2 (A + I) D^-1/2 (undirected).  Hoisted so a static
    edge_list is only processed once, not on every forward call."""
    src, dst = edge_list[0], edge_list[1]
    a = jnp.zeros((n_nodes, n_nodes), jnp.float32)
    a = a.at[src, dst].set(1.0)
    a = a.at[dst, src].set(1.0)
    a = jnp.maximum(a, jnp.eye(n_nodes, dtype=jnp.float32))     # add self loops
    deg = jnp.sum(a, axis=1)
    dinv = jnp.where(deg > 0, lax.rsqrt(deg), 0.0)
    return (dinv[:, None] * a * dinv[None, :]).astype(jnp.bfloat16)   # MXU operand -> bf16


def prepare_operands(params, batch):
    """Tile / block-diagonalize weights for the flat (N, B*C) graph layout and cast all
    MXU operands to bf16 (BN params and biases stay f32).  Cache per (params, batch).

    Note: the block-diagonal feature weight costs B x structural-zero FLOPs and O(B^2)
    weight memory; for large per-call batches switch to a (B*N, Cin) flat feature matmul
    instead.  For the small per-call batches this model uses, it keeps every graph matmul
    a single reshape-free 2-D MXU op.
    """
    bf16, f32 = jnp.bfloat16, jnp.float32
    eye_b = jnp.eye(batch, dtype=f32)

    def blkdiag(w):            # (Cin, Cout) -> (B*Cin, B*Cout); block b applies to batch b
        return jnp.kron(eye_b, w.astype(f32)).astype(bf16)

    def tile_bias(b):          # (C,) -> (1, B*C)
        return jnp.tile(b.astype(f32), batch).reshape(1, -1)

    return dict(
        w1_blk=blkdiag(params['w_g1']), b1_tiled=tile_bias(params['b_g1']),
        gamma1=params['gamma1'].astype(f32).reshape(-1, 1),
        beta1=params['beta1'].astype(f32).reshape(-1, 1),
        w2_blk=blkdiag(params['w_g2']), b2_tiled=tile_bias(params['b_g2']),
        gamma2=params['gamma2'].astype(f32).reshape(-1, 1),
        beta2=params['beta2'].astype(f32).reshape(-1, 1),
        w_l1=params['w_l1'].astype(bf16), b_l1=params['b_l1'].astype(f32).reshape(1, -1),
        w_l2=params['w_l2'].astype(bf16), b_l2=params['b_l2'].astype(f32).reshape(1, -1),
        w_fc_g=params['w_fc'][:32].astype(bf16),    # fc weight, graph half
        w_fc_f=params['w_fc'][32:].astype(bf16),    # fc weight, fingerprint half
        b_fc=params['b_fc'].astype(f32).reshape(1, -1),
    )


def classifier_forward(x_fingerprints, x_node_features, a_hat, prepped):
    B, N, C = x_node_features.shape
    O = prepped['b_fc'].shape[1]

    # (B, N, C) -> flat (N, B*C): node on sublanes, batch*feature on lanes (wrapper glue).
    xg_flat = (jnp.transpose(x_node_features, (1, 0, 2))
               .reshape(N, B * C).astype(jnp.bfloat16))
    xf = x_fingerprints.astype(jnp.bfloat16)

    inputs = (
        a_hat, xg_flat,
        prepped['w1_blk'], prepped['b1_tiled'], prepped['gamma1'], prepped['beta1'],
        prepped['w2_blk'], prepped['b2_tiled'], prepped['gamma2'], prepped['beta2'],
        xf, prepped['w_l1'], prepped['b_l1'], prepped['w_l2'], prepped['b_l2'],
        prepped['w_fc_g'], prepped['w_fc_f'], prepped['b_fc'],
    )

    vmem = pl.BlockSpec(memory_space=pltpu.MemorySpace.VMEM)
    # TODO(synk): a batch-tiled grid with dimension_semantics=('parallel',) would use both
    # v7x TensorCores, but per-tile BatchNorm stats != full-batch training-mode stats; the
    # single call keeps the exact BN semantics of the PyTorch module (everything fits VMEM).
    return pl.pallas_call(
        functools.partial(classifier_kernel, batch=B),
        out_shape=jax.ShapeDtypeStruct((B, O), jnp.float32),
        in_specs=[vmem] * len(inputs),
        out_specs=pl.BlockSpec(memory_space=pltpu.MemorySpace.VMEM),
    )(*inputs)


def make_params(key, descriptors_input_dim, graph_nodes_max_dim, output_dim):
    D, N, O = descriptors_input_dim, graph_nodes_max_dim, output_dim
    ks = jax.random.split(key, 8)
    f32 = jnp.float32

    def kaiming(k, fan_in, shape):
        return (jax.random.normal(k, shape, f32) * jnp.sqrt(2.0 / fan_in)).astype(f32)

    return {
        # GCNConv(67 -> 64), GCNConv(64 -> 32)   (weights stored as (in, out))
        'w_g1': kaiming(ks[0], 67, (67, 64)), 'b_g1': jnp.zeros((64,), f32),
        'w_g2': kaiming(ks[1], 64, (64, 32)), 'b_g2': jnp.zeros((32,), f32),
        # BatchNorm1d(graph_nodes_max_dim) x2  (PyTorch default init: gamma=1, beta=0)
        'gamma1': jnp.ones((N,), f32), 'beta1': jnp.zeros((N,), f32),
        'gamma2': jnp.ones((N,), f32), 'beta2': jnp.zeros((N,), f32),
        # Linear(D, 400), Linear(400, 64) with kaiming-normal weights
        'w_l1': kaiming(ks[2], D, (D, 400)),
        'b_l1': (jax.random.uniform(ks[3], (400,), f32) - 0.5) * (2.0 / jnp.sqrt(D)),
        'w_l2': kaiming(ks[4], 400, (400, 64)),
        'b_l2': (jax.random.uniform(ks[5], (64,), f32) - 0.5) * (2.0 / jnp.sqrt(400.0)),
        # fc: Linear(96, O)
        'w_fc': (jax.random.normal(ks[6], (96, O), f32) / jnp.sqrt(96.0)).astype(f32),
        'b_fc': (jax.random.uniform(ks[7], (O,), f32) - 0.5) * (2.0 / jnp.sqrt(96.0)),
    }


if __name__ == "__main__":
    key = jax.random.PRNGKey(0)
    B = 2                      # batch of molecules
    N = 16                     # graph_nodes_max_dim
    D = 128                    # descriptors_input_dim
    O = 8                      # output_dim
    E = 24                     # number of edges (shared edge list, dense-batched graphs)

    k_fp, k_nodes, k_src, k_dst, k_params = jax.random.split(key, 5)
    x_fingerprints = jax.random.normal(k_fp, (B, D), jnp.float32)
    x_node_features = jax.random.normal(k_nodes, (B, N, 67), jnp.float32)
    edge_list = jnp.stack([
        jax.random.randint(k_src, (E,), 0, N, jnp.int32),
        jax.random.randint(k_dst, (E,), 0, N, jnp.int32),
    ], axis=0)                                                   # (2, E)

    params = make_params(k_params, D, N, O)

    # Hoisted / cacheable preprocessing (static per model + edge list + batch size).
    a_hat = build_normalized_adjacency(edge_list, N)
    prepped = prepare_operands(params, B)

    out = classifier_forward(x_fingerprints, x_node_features, a_hat, prepped)
    out = jax.block_until_ready(out)

    assert out.shape == (B, O)
    assert bool(jnp.all(jnp.isfinite(out)))
    # softmax rows sum to ~1 (approx reciprocal used in the normalization)
    assert bool(jnp.allclose(jnp.sum(out, axis=1), 1.0, atol=5e-3))
    print("KERNEL_OK")
</pallas_src>

<mosaic_0001>
module attributes {stable_mosaic.version = 11 : i64} {
  func.func @classifier_kernel(%arg0: memref<16x16xbf16, #tpu.memory_space<vmem>>, %arg1: memref<16x134xbf16, #tpu.memory_space<vmem>>, %arg2: memref<134x128xbf16, #tpu.memory_space<vmem>>, %arg3: memref<1x128xf32, #tpu.memory_space<vmem>>, %arg4: memref<16x1xf32, #tpu.memory_space<vmem>>, %arg5: memref<16x1xf32, #tpu.memory_space<vmem>>, %arg6: memref<128x64xbf16, #tpu.memory_space<vmem>>, %arg7: memref<1x64xf32, #tpu.memory_space<vmem>>, %arg8: memref<16x1xf32, #tpu.memory_space<vmem>>, %arg9: memref<16x1xf32, #tpu.memory_space<vmem>>, %arg10: memref<2x128xbf16, #tpu.memory_space<vmem>>, %arg11: memref<128x400xbf16, #tpu.memory_space<vmem>>, %arg12: memref<1x400xf32, #tpu.memory_space<vmem>>, %arg13: memref<400x64xbf16, #tpu.memory_space<vmem>>, %arg14: memref<1x64xf32, #tpu.memory_space<vmem>>, %arg15: memref<32x8xbf16, #tpu.memory_space<vmem>>, %arg16: memref<64x8xbf16, #tpu.memory_space<vmem>>, %arg17: memref<1x8xf32, #tpu.memory_space<vmem>>, %arg18: memref<2x8xf32, #tpu.memory_space<vmem>>) attributes {dimension_semantics = [], scalar_prefetch = 0 : i64, scratch_operands = 0 : i64, tpu.core_type = #tpu.core_type<tc>} {
    %c0 = arith.constant 0 : index
    %c0_0 = arith.constant 0 : index
    %0 = vector.load %arg0[%c0, %c0_0] : memref<16x16xbf16, #tpu.memory_space<vmem>>, vector<16x16xbf16>
    %c0_1 = arith.constant 0 : index
    %c0_2 = arith.constant 0 : index
    %1 = vector.load %arg1[%c0_1, %c0_2] : memref<16x134xbf16, #tpu.memory_space<vmem>>, vector<16x134xbf16>
    %c0_3 = arith.constant 0 : index
    %c0_4 = arith.constant 0 : index
    %2 = vector.load %arg2[%c0_3, %c0_4] : memref<134x128xbf16, #tpu.memory_space<vmem>>, vector<134x128xbf16>
    %cst = arith.constant dense<0.000000e+00> : vector<16x128xf32>
    %3 = tpu.matmul %1, %2, %cst {dimension_numbers = #tpu.dot_dimension_numbers<[1], [0], [0], [1], [0, 0, 1, 1], [], []>} : vector<16x134xbf16>, vector<134x128xbf16>, vector<16x128xf32> -> vector<16x128xf32>
    %4 = arith.truncf %3 : vector<16x128xf32> to vector<16x128xbf16>
    %cst_5 = arith.constant dense<0.000000e+00> : vector<16x128xf32>
    %5 = tpu.matmul %0, %4, %cst_5 {dimension_numbers = #tpu.dot_dimension_numbers<[1], [0], [0], [1], [0, 0, 1, 1], [], []>} : vector<16x16xbf16>, vector<16x128xbf16>, vector<16x128xf32> -> vector<16x128xf32>
    %c0_6 = arith.constant 0 : index
    %c0_7 = arith.constant 0 : index
    %6 = vector.load %arg3[%c0_6, %c0_7] : memref<1x128xf32, #tpu.memory_space<vmem>>, vector<1x128xf32>
    %7 = vector.broadcast %6 : vector<1x128xf32> to vector<16x128xf32>
    %8 = arith.addf %5, %7 : vector<16x128xf32>
    %c0_8 = arith.constant 0 : index
    %c0_9 = arith.constant 0 : index
    %9 = vector.load %arg4[%c0_8, %c0_9] : memref<16x1xf32, #tpu.memory_space<vmem>>, vector<16x1xf32>
    %c0_10 = arith.constant 0 : index
    %c0_11 = arith.constant 0 : index
    %10 = vector.load %arg5[%c0_10, %c0_11] : memref<16x1xf32, #tpu.memory_space<vmem>>, vector<16x1xf32>
    %cst_12 = arith.constant dense<0.000000e+00> : vector<16xf32>
    %11 = vector.multi_reduction <add>, %8, %cst_12 [1] : vector<16x128xf32> to vector<16xf32>
    %12 = vector.shape_cast %11 : vector<16xf32> to vector<16x1xf32>
    %cst_13 = arith.constant 7.812500e-03 : f32
    %13 = vector.broadcast %cst_13 : f32 to vector<16x1xf32>
    %14 = arith.mulf %12, %13 : vector<16x1xf32>
    %15 = arith.mulf %8, %8 : vector<16x128xf32>
    %cst_14 = arith.constant dense<0.000000e+00> : vector<16xf32>
    %16 = vector.multi_reduction <add>, %15, %cst_14 [1] : vector<16x128xf32> to vector<16xf32>
    %17 = vector.shape_cast %16 : vector<16xf32> to vector<16x1xf32>
    %cst_15 = arith.constant 7.812500e-03 : f32
    %18 = vector.broadcast %cst_15 : f32 to vector<16x1xf32>
    %19 = arith.mulf %17, %18 : vector<16x1xf32>
    %20 = arith.mulf %14, %14 : vector<16x1xf32>
    %21 = arith.subf %19, %20 : vector<16x1xf32>
    %cst_16 = arith.constant 0.000000e+00 : f32
    %22 = vector.broadcast %cst_16 : f32 to vector<16x1xf32>
    %23 = arith.maximumf %21, %22 : vector<16x1xf32>
    %cst_17 = arith.constant 9.99999974E-6 : f32
    %24 = vector.broadcast %cst_17 : f32 to vector<16x1xf32>
    %25 = arith.addf %23, %24 : vector<16x1xf32>
    %26 = math.rsqrt %25 : vector<16x1xf32>
    %27 = arith.mulf %9, %26 : vector<16x1xf32>
    %28 = arith.mulf %14, %27 : vector<16x1xf32>
    %29 = arith.subf %10, %28 : vector<16x1xf32>
    %30 = vector.broadcast %27 : vector<16x1xf32> to vector<16x128xf32>
    %31 = arith.mulf %8, %30 : vector<16x128xf32>
    %32 = vector.broadcast %29 : vector<16x1xf32> to vector<16x128xf32>
    %33 = arith.addf %31, %32 : vector<16x128xf32>
    %cst_18 = arith.constant 0.000000e+00 : f32
    %34 = vector.broadcast %cst_18 : f32 to vector<16x128xf32>
    %35 = arith.maximumf %33, %34 : vector<16x128xf32>
    %36 = arith.truncf %35 : vector<16x128xf32> to vector<16x128xbf16>
    %c0_19 = arith.constant 0 : index
    %c0_20 = arith.constant 0 : index
    %37 = vector.load %arg6[%c0_19, %c0_20] : memref<128x64xbf16, #tpu.memory_space<vmem>>, vector<128x64xbf16>
    %cst_21 = arith.constant dense<0.000000e+00> : vector<16x64xf32>
    %38 = tpu.matmul %36, %37, %cst_21 {dimension_numbers = #tpu.dot_dimension_numbers<[1], [0], [0], [1], [0, 0, 1, 1], [], []>} : vector<16x128xbf16>, vector<128x64xbf16>, vector<16x64xf32> -> vector<16x64xf32>
    %39 = arith.truncf %38 : vector<16x64xf32> to vector<16x64xbf16>
    %cst_22 = arith.constant dense<0.000000e+00> : vector<16x64xf32>
    %40 = tpu.matmul %0, %39, %cst_22 {dimension_numbers = #tpu.dot_dimension_numbers<[1], [0], [0], [1], [0, 0, 1, 1], [], []>} : vector<16x16xbf16>, vector<16x64xbf16>, vector<16x64xf32> -> vector<16x64xf32>
    %c0_23 = arith.constant 0 : index
    %c0_24 = arith.constant 0 : index
    %41 = vector.load %arg7[%c0_23, %c0_24] : memref<1x64xf32, #tpu.memory_space<vmem>>, vector<1x64xf32>
    %42 = vector.broadcast %41 : vector<1x64xf32> to vector<16x64xf32>
    %43 = arith.addf %40, %42 : vector<16x64xf32>
    %c0_25 = arith.constant 0 : index
    %c0_26 = arith.constant 0 : index
    %44 = vector.load %arg8[%c0_25, %c0_26] : memref<16x1xf32, #tpu.memory_space<vmem>>, vector<16x1xf32>
    %c0_27 = arith.constant 0 : index
    %c0_28 = arith.constant 0 : index
    %45 = vector.load %arg9[%c0_27, %c0_28] : memref<16x1xf32, #tpu.memory_space<vmem>>, vector<16x1xf32>
    %cst_29 = arith.constant dense<0.000000e+00> : vector<16xf32>
    %46 = vector.multi_reduction <add>, %43, %cst_29 [1] : vector<16x64xf32> to vector<16xf32>
    %47 = vector.shape_cast %46 : vector<16xf32> to vector<16x1xf32>
    %cst_30 = arith.constant 1.562500e-02 : f32
    %48 = vector.broadcast %cst_30 : f32 to vector<16x1xf32>
    %49 = arith.mulf %47, %48 : vector<16x1xf32>
    %50 = arith.mulf %43, %43 : vector<16x64xf32>
    %cst_31 = arith.constant dense<0.000000e+00> : vector<16xf32>
    %51 = vector.multi_reduction <add>, %50, %cst_31 [1] : vector<16x64xf32> to vector<16xf32>
    %52 = vector.shape_cast %51 : vector<16xf32> to vector<16x1xf32>
    %cst_32 = arith.constant 1.562500e-02 : f32
    %53 = vector.broadcast %cst_32 : f32 to vector<16x1xf32>
    %54 = arith.mulf %52, %53 : vector<16x1xf32>
    %55 = arith.mulf %49, %49 : vector<16x1xf32>
    %56 = arith.subf %54, %55 : vector<16x1xf32>
    %cst_33 = arith.constant 0.000000e+00 : f32
    %57 = vector.broadcast %cst_33 : f32 to vector<16x1xf32>
    %58 = arith.maximumf %56, %57 : vector<16x1xf32>
    %cst_34 = arith.constant 9.99999974E-6 : f32
    %59 = vector.broadcast %cst_34 : f32 to vector<16x1xf32>
    %60 = arith.addf %58, %59 : vector<16x1xf32>
    %61 = math.rsqrt %60 : vector<16x1xf32>
    %62 = arith.mulf %44, %61 : vector<16x1xf32>
    %63 = arith.mulf %49, %62 : vector<16x1xf32>
    %64 = arith.subf %45, %63 : vector<16x1xf32>
    %65 = vector.broadcast %62 : vector<16x1xf32> to vector<16x64xf32>
    %66 = arith.mulf %43, %65 : vector<16x64xf32>
    %67 = vector.broadcast %64 : vector<16x1xf32> to vector<16x64xf32>
    %68 = arith.addf %66, %67 : vector<16x64xf32>
    %cst_35 = arith.constant 0.000000e+00 : f32
    %69 = vector.broadcast %cst_35 : f32 to vector<16x64xf32>
    %70 = arith.maximumf %68, %69 : vector<16x64xf32>
    %cst_36 = arith.constant dense<0xFF800000> : vector<64xf32>
    %71 = vector.multi_reduction <maximumf>, %70, %cst_36 [0] : vector<16x64xf32> to vector<64xf32>
    %72 = vector.shape_cast %71 : vector<64xf32> to vector<1x64xf32>
    %73 = vector.extract_strided_slice %72 {offsets = [0, 0], sizes = [1, 32], strides = [1, 1]} : vector<1x64xf32> to vector<1x32xf32>
    %74 = vector.extract_strided_slice %72 {offsets = [0, 32], sizes = [1, 32], strides = [1, 1]} : vector<1x64xf32> to vector<1x32xf32>
    %75 = tpu.concatenate %73, %74 in 0 : vector<1x32xf32>, vector<1x32xf32> -> vector<2x32xf32>
    %c0_37 = arith.constant 0 : index
    %c0_38 = arith.constant 0 : index
    %76 = vector.load %arg10[%c0_37, %c0_38] : memref<2x128xbf16, #tpu.memory_space<vmem>>, vector<2x128xbf16>
    %c0_39 = arith.constant 0 : index
    %c0_40 = arith.constant 0 : index
    %77 = vector.load %arg11[%c0_39, %c0_40] : memref<128x400xbf16, #tpu.memory_space<vmem>>, vector<128x400xbf16>
    %cst_41 = arith.constant dense<0.000000e+00> : vector<2x400xf32>
    %78 = tpu.matmul %76, %77, %cst_41 {dimension_numbers = #tpu.dot_dimension_numbers<[1], [0], [0], [1], [0, 0, 1, 1], [], []>} : vector<2x128xbf16>, vector<128x400xbf16>, vector<2x400xf32> -> vector<2x400xf32>
    %c0_42 = arith.constant 0 : index
    %c0_43 = arith.constant 0 : index
    %79 = vector.load %arg12[%c0_42, %c0_43] : memref<1x400xf32, #tpu.memory_space<vmem>>, vector<1x400xf32>
    %80 = vector.broadcast %79 : vector<1x400xf32> to vector<2x400xf32>
    %81 = arith.addf %78, %80 : vector<2x400xf32>
    %cst_44 = arith.constant 0.000000e+00 : f32
    %82 = vector.broadcast %cst_44 : f32 to vector<2x400xf32>
    %83 = arith.maximumf %81, %82 : vector<2x400xf32>
    %84 = arith.truncf %83 : vector<2x400xf32> to vector<2x400xbf16>
    %c0_45 = arith.constant 0 : index
    %c0_46 = arith.constant 0 : index
    %85 = vector.load %arg13[%c0_45, %c0_46] : memref<400x64xbf16, #tpu.memory_space<vmem>>, vector<400x64xbf16>
    %cst_47 = arith.constant dense<0.000000e+00> : vector<2x64xf32>
    %86 = tpu.matmul %84, %85, %cst_47 {dimension_numbers = #tpu.dot_dimension_numbers<[1], [0], [0], [1], [0, 0, 1, 1], [], []>} : vector<2x400xbf16>, vector<400x64xbf16>, vector<2x64xf32> -> vector<2x64xf32>
    %c0_48 = arith.constant 0 : index
    %c0_49 = arith.constant 0 : index
    %87 = vector.load %arg14[%c0_48, %c0_49] : memref<1x64xf32, #tpu.memory_space<vmem>>, vector<1x64xf32>
    %88 = vector.broadcast %87 : vector<1x64xf32> to vector<2x64xf32>
    %89 = arith.addf %86, %88 : vector<2x64xf32>
    %cst_50 = arith.constant 0.000000e+00 : f32
    %90 = vector.broadcast %cst_50 : f32 to vector<2x64xf32>
    %91 = arith.maximumf %89, %90 : vector<2x64xf32>
    %92 = arith.truncf %75 : vector<2x32xf32> to vector<2x32xbf16>
    %c0_51 = arith.constant 0 : index
    %c0_52 = arith.constant 0 : index
    %93 = vector.load %arg15[%c0_51, %c0_52] : memref<32x8xbf16, #tpu.memory_space<vmem>>, vector<32x8xbf16>
    %cst_53 = arith.constant dense<0.000000e+00> : vector<2x8xf32>
    %94 = tpu.matmul %92, %93, %cst_53 {dimension_numbers = #tpu.dot_dimension_numbers<[1], [0], [0], [1], [0, 0, 1, 1], [], []>} : vector<2x32xbf16>, vector<32x8xbf16>, vector<2x8xf32> -> vector<2x8xf32>
    %95 = arith.truncf %91 : vector<2x64xf32> to vector<2x64xbf16>
    %c0_54 = arith.constant 0 : index
    %c0_55 = arith.constant 0 : index
    %96 = vector.load %arg16[%c0_54, %c0_55] : memref<64x8xbf16, #tpu.memory_space<vmem>>, vector<64x8xbf16>
    %cst_56 = arith.constant dense<0.000000e+00> : vector<2x8xf32>
    %97 = tpu.matmul %95, %96, %cst_56 {dimension_numbers = #tpu.dot_dimension_numbers<[1], [0], [0], [1], [0, 0, 1, 1], [], []>} : vector<2x64xbf16>, vector<64x8xbf16>, vector<2x8xf32> -> vector<2x8xf32>
    %98 = arith.addf %94, %97 : vector<2x8xf32>
    %c0_57 = arith.constant 0 : index
    %c0_58 = arith.constant 0 : index
    %99 = vector.load %arg17[%c0_57, %c0_58] : memref<1x8xf32, #tpu.memory_space<vmem>>, vector<1x8xf32>
    %100 = vector.broadcast %99 : vector<1x8xf32> to vector<2x8xf32>
    %101 = arith.addf %98, %100 : vector<2x8xf32>
    %cst_59 = arith.constant dense<0xFF800000> : vector<2xf32>
    %102 = vector.multi_reduction <maximumf>, %101, %cst_59 [1] : vector<2x8xf32> to vector<2xf32>
    %103 = vector.shape_cast %102 : vector<2xf32> to vector<2x1xf32>
    %104 = vector.broadcast %103 : vector<2x1xf32> to vector<2x8xf32>
    %105 = arith.subf %101, %104 : vector<2x8xf32>
    %106 = math.exp %105 : vector<2x8xf32>
    %cst_60 = arith.constant dense<0.000000e+00> : vector<2xf32>
    %107 = vector.multi_reduction <add>, %106, %cst_60 [1] : vector<2x8xf32> to vector<2xf32>
    %108 = vector.shape_cast %107 : vector<2xf32> to vector<2x1xf32>
    %109 = tpu.reciprocal %108 {approx = true} : vector<2x1xf32> -> vector<2x1xf32>
    %110 = vector.broadcast %109 : vector<2x1xf32> to vector<2x8xf32>
    %111 = arith.mulf %106, %110 : vector<2x8xf32>
    %c0_61 = arith.constant 0 : index
    %c0_62 = arith.constant 0 : index
    %112 = vector.load %arg18[%c0_61, %c0_62] : memref<2x8xf32, #tpu.memory_space<vmem>>, vector<2x8xf32>
    tpu.vector_store %arg18[%c0_61, %c0_62], %111 {strides = array<i32>} : memref<2x8xf32, #tpu.memory_space<vmem>>, vector<2x8xf32>,
    return
  }
}

</mosaic_0001>

<bundles_post_ra>
// kernel: tpu_custom_call.1
= control target key start
LH: loop header
LB: loop body
LE: loop exit
PB: predicated region body
PF: predicated region fallthrough
CT: control target
= control target key end

     0   :  { %s2135_s0 = inlined_call_operand.vmem [shape: bf16[16,16], index: 0, kind: input, shape index: {}]   ;;  %s2136_s1 = inlined_call_operand.vmem [shape: bf16[16,134], index: 1, kind: input, shape index: {}]   ;;  %s2137_s2 = inlined_call_operand.vmem [shape: bf16[134,128], index: 2, kind: input, shape index: {}]   ;;  %s2138_s3 = inlined_call_operand.vmem [shape: f32[1,128], index: 3, kind: input, shape index: {}]   ;;  %s2139_s4 = inlined_call_operand.vmem [shape: f32[16,1], index: 4, kind: input, shape index: {}]   ;;  %s2140_s5 = inlined_call_operand.vmem [shape: f32[16,1], index: 5, kind: input, shape index: {}]   ;;  %s2141_s6 = inlined_call_operand.vmem [shape: bf16[128,64], index: 6, kind: input, shape index: {}]   ;;  %s2142_s7 = inlined_call_operand.vmem [shape: f32[1,64], index: 7, kind: input, shape index: {}]   ;;  %s2143_s8 = inlined_call_operand.vmem [shape: f32[16,1], index: 8, kind: input, shape index: {}]   ;;  %s2144_s9 = inlined_call_operand.vmem [shape: f32[16,1], index: 9, kind: input, shape index: {}]   ;;  %s2145_s10 = inlined_call_operand.vmem [shape: bf16[2,128], index: 10, kind: input, shape index: {}]   ;;  %s2146_s11 = inlined_call_operand.vmem [shape: bf16[128,400], index: 11, kind: input, shape index: {}]   ;;  %s2147_s12 = inlined_call_operand.vmem [shape: f32[1,400], index: 12, kind: input, shape index: {}]   ;;  %s2148_s13 = inlined_call_operand.vmem [shape: bf16[400,64], index: 13, kind: input, shape index: {}]   ;;  %s2149_s14 = inlined_call_operand.vmem [shape: f32[1,64], index: 14, kind: input, shape index: {}]   ;;  %s2150_s15 = inlined_call_operand.vmem [shape: bf16[32,8], index: 15, kind: input, shape index: {}]   ;;  %s2151_s16 = inlined_call_operand.vmem [shape: bf16[64,8], index: 16, kind: input, shape index: {}]   ;;  %s2152_s17 = inlined_call_operand.vmem [shape: f32[1,8], index: 17, kind: input, shape index: {}]   ;;  %s2153_s18 = inlined_call_operand.hbm [shape: f32[2,8], index: 18, kind: output, shape index: {}]  }
   0x1   :  { %2156 = sst [smem:[#allocation5_spill]] %s2135_s0 }
   0x2   :  { %2157 = sst [smem:[#allocation6_spill]] %s2136_s1 }
   0x3   :  { %2158 = sst [smem:[#allocation7_spill]] %s2137_s2 }
   0x4   :  { %s2159_s29 = sld [smem:[#allocation7_spill]]  ;;  %v1643_v1 = vmov 0   ;;  %vm142_vm0 = vcmask 48128   ;;  %s2160_s23 = sld [smem:[#allocation6_spill]]  ;;  %vm146_vm1 = vcmask 1042432  }
   0x5   :  { %150 = vmatprep.subr.bf16.mxu0 %v1643_v1  ;;  %1505 = vset.pattern.permute.xlu0 %v1643_v1 }
   0x6   :  { %1506 = vset.pattern.permute.xlu1 %v1643_v1 }
   0xa   :  { %v1507_v0 = vld [vmem:[%s2159_s29] sm:$0xff]   ;;  %v1508_v2 = vld [vmem:[%s2159_s29 + $0x8] sm:$0xff]   ;;  %v1509_v3 = vld [vmem:[%s2159_s29 + $0x10] sm:$0xff]  }
   0xb   :  { %151 = vmatpush1.bf16.msra.mxu0 %v1507_v0  ;;  %v1510_v4 = vld [vmem:[%s2159_s29 + $0x18] sm:$0xff]   ;;  %v1518_v5 = vld [vmem:[%s2160_s23 + $0x4] ss:$8 sps:$4 sm:$0xff]   ;;  %v1513_v8 = vld [vmem:[%s2159_s29 + $0x30] sm:$0xff]  }
   0xc   :  { %152 = vmatprep.subr.bf16.mxu0 %v1643_v1  ;;  %1323 = vmatprep.mubr.msk.bf16.mxu0 %vm142_vm0, %v1518_v5  ;;  %v1511_v6 = vld [vmem:[%s2159_s29 + $0x20] sm:$0xff]   ;;  %v1512_v7 = vld [vmem:[%s2159_s29 + $0x28] sm:$0xff]   ;;  %v1514_v10 = vld [vmem:[%s2159_s29 + $0x38] sm:$0xff]  }
   0xd   :  { %v1515_v9 = vld [vmem:[%s2159_s29 + $0x40] ss:$0 sps:$4 sm:$0x77]  }
   0xe   :  { %v148_v11 = vsel %vm146_vm1, %v1515_v9, 0  ;;  %v1516_v12 = vld [vmem:[%s2160_s23] ss:$8 sps:$4 sm:$0xff]  }
   0xf   :  { %153 = vmatpush1.bf16.msra.mxu0 %v1508_v2 }
  0x10   :  { %154 = vmatprep.subr.bf16.mxu0 %v1643_v1 }
  0x13   :  { %155 = vmatpush1.bf16.msra.mxu0 %v1509_v3 }
  0x14   :  { %156 = vmatprep.subr.bf16.mxu0 %v1643_v1 }
  0x17   :  { %157 = vmatpush1.bf16.msra.mxu0 %v1510_v4 }
  0x18   :  { %158 = vmatprep.subr.bf16.mxu0 %v1643_v1 }
  0x1b   :  { %159 = vmatpush1.bf16.msra.mxu0 %v1511_v6 }
  0x1c   :  { %160 = vmatprep.subr.bf16.mxu0 %v1643_v1 }
  0x1f   :  { %161 = vmatpush1.bf16.msra.mxu0 %v1512_v7 }
  0x20   :  { %162 = vmatprep.subr.bf16.mxu0 %v1643_v1 }
  0x23   :  { %163 = vmatpush1.bf16.msra.mxu0 %v1513_v8 }
  0x24   :  { %164 = vmatprep.subr.bf16.mxu0 %v1643_v1 }
  0x27   :  { %165 = vmatpush1.bf16.msra.mxu0 %v1514_v10 }
  0x28   :  { %166 = vmatprep.subr.bf16.mxu0 %v1643_v1 }
  0x2b   :  { %167 = vmatpush1.bf16.msra.mxu0 %v148_v11 }
  0x2e   :  { %183 = vmatmul.mubr.bf16.vlgmr.msra.gmra.mrb[0].mxu0 %v1516_v12 }
  0x2f   :  { %23 = vsyncpa [#allocation3], 0  ;;  %v1644_v13 = vmov 0.0   ;;  %vm1645_vm2 = vmmov 0   ;;  %s2161_s23 = sld [smem:[#allocation5_spill]]  ;;  %vm204_vm3 = vcmask 130048  }
  0x30   :  { %1448 = vmatprep.subr.bf16.mxu1 %v1644_v13  ;;  %1474 = vmatprep.subr.bf16.mxu0 %v1644_v13  ;;  %v1324_v20 = vld [vmem:[%s2138_s3] ss:$0 sm:$0xff]  ;;  %v1521_v30 = vld [vmem:[%s2141_s6 + $0x8] sm:$0xff]   ;;  %v1522_v31 = vld [vmem:[%s2141_s6 + $0x10] sm:$0xff]   ;;  %vm468_vm4 = vcmask 523264   ;;  %vm542_vm5 = vcmask 1040384  }
  0x31   :  { %1450 = vmatprep.mubr.msk.bf16.mxu1 %vm1645_vm2, %v1644_v13  ;;  %1476 = vmatprep.mubr.msk.bf16.mxu0 %vm1645_vm2, %v1644_v13  ;;  %v1520_v29 = vld [vmem:[%s2141_s6] sm:$0xff]   ;;  %v1523_v32 = vld [vmem:[%s2141_s6 + $0x18] sm:$0xff]   ;;  %v250_v52 = vld [vmem:[%s2139_s4 + $0x8] sm:$0xff]  ;;  %vm1233_vm6 = vcmask 261120   ;;  %vm1285_vm7 = vcmask 58368  }
  0x32   :  { %v249_v49 = vld [vmem:[%s2139_s4] sm:$0xff]  ;;  %v1525_v58 = vld [vmem:[%s2141_s6 + $0x28] sm:$0xff]   ;;  %v1526_v62 = vld [vmem:[%s2141_s6 + $0x30] sm:$0xff]  }
  0x33   :  { %v1524_v53 = vld [vmem:[%s2141_s6 + $0x20] sm:$0xff]   ;;  %v252_v61 = vld [vmem:[%s2140_s5 + $0x8] sm:$0xff]  ;;  %v1527_v0 = vld [vmem:[%s2141_s6 + $0x38] sm:$0xff]  }
  0x34   :  { %v251_v57 = vld [vmem:[%s2140_s5] sm:$0xff] }
  0x35   :  { %v1796_v19 = vld [vmem:[%s2161_s23] sm:$0xff]  }
 0x101   :  { %v184_v14 = vpop.f32.mrb[0].mxu0 }
 0x102   :  { %v186_v15 = vpop.f32.mrb[1].mxu0 }
 0x103   :  { %v187_v16 = vpop.f32.mrb[2].mxu0  ;;  %v1530_v15 = vld [vmem:[%s2146_s11 + $0x4] ss:$16 sps:$4 sm:$0xff]  }
 0x104   :  { %v191_v17 = vpack.c.bf16 %v187_v16, %v184_v14  ;;  %v189_v18 = vpop.f32.mrb[3].mxu0  ;;  %v1528_v14 = vld [vmem:[%s2146_s11] ss:$16 sps:$4 sm:$0xff]   ;;  %v1533_v16 = vld [vmem:[%s2146_s11 + $0x24] ss:$16 sps:$4 sm:$0xff]  }
 0x105   :  { %v1539_v18 = vld [vmem:[%s2146_s11 + $0x44] ss:$16 sps:$4 sm:$0xff]  }
 0x106   :  { %1449 = vmatpush3.bf16.msra.mxu1 %v191_v17  ;;  %v1531_v17 = vld [vmem:[%s2146_s11 + $0x20] ss:$16 sps:$4 sm:$0xff]  }
 0x107   :  { %1454 = vmatprep.subr.bf16.mxu1 %v1644_v13 }
 0x109   :  { %1451 = vmatmul.mubr.msk.bf16.vlgmr.msra.gmra.mrb[0].mxu1 %vm204_vm3, %v1796_v19 }
 0x10a   :  { %1470 = vmatprep.mubr.msk.bf16.mxu1 %vm1645_vm2, %v1644_v13  ;;  %1455 = vmatpush3.bf16.msra.mxu1 %v1520_v29  ;;  %v1569_v29 = vld [vmem:[%s2146_s11 + $0xe4] ss:$16 sps:$4 sm:$0xff]  }
 0x10b   :  { %1456 = vmatprep.subr.bf16.mxu1 %v1644_v13 }
 0x10e   :  { %1457 = vmatpush3.bf16.msra.mxu1 %v1521_v30  ;;  %v1567_v30 = vld [vmem:[%s2146_s11 + $0xe0] ss:$16 sps:$4 sm:$0xff]  }
 0x10f   :  { %1458 = vmatprep.subr.bf16.mxu1 %v1644_v13 }
 0x112   :  { %1459 = vmatpush3.bf16.msra.mxu1 %v1522_v31 }
 0x113   :  { %1460 = vmatprep.subr.bf16.mxu1 %v1644_v13 }
 0x116   :  { %1461 = vmatpush3.bf16.msra.mxu1 %v1523_v32 }
 0x117   :  { %1462 = vmatprep.subr.bf16.mxu1 %v1644_v13 }
 0x11a   :  { %1463 = vmatpush3.bf16.msra.mxu1 %v1524_v53 }
 0x11b   :  { %1464 = vmatprep.subr.bf16.mxu1 %v1644_v13 }
 0x11e   :  { %1465 = vmatpush3.bf16.msra.mxu1 %v1525_v58 }
 0x11f   :  { %1466 = vmatprep.subr.bf16.mxu1 %v1644_v13 }
 0x122   :  { %1467 = vmatpush3.bf16.msra.mxu1 %v1526_v62 }
 0x123   :  { %1468 = vmatprep.subr.bf16.mxu1 %v1644_v13 }
 0x126   :  { %1469 = vmatpush3.bf16.msra.mxu1 %v1527_v0 }
 0x127   :  { %759 = vmatprep.subr.bf16.mxu1 %v1530_v15  ;;  %v1588_v15 = vld [vmem:[%s2148_s13 + $0x60] sm:$0xff]  }
 0x1dc   :  { %v242_v21 = vpop.f32.mrb[0].mxu1 }
 0x1dd   :  { %v1806_v22 = vadd.f32 %v1324_v20, %v242_v21  ;;  %v1452_v23 = vpop.f32.mrb[1].mxu1  ;;  %v1545_v21 = vld [vmem:[%s2146_s11 + $0x64] ss:$16 sps:$4 sm:$0xff]  }
 0x1de   :  { %v245_v24 = vpop.f32.mrb[2].mxu1  ;;  %v1551_v23 = vld [vmem:[%s2146_s11 + $0x84] ss:$16 sps:$4 sm:$0xff]  }
 0x1df   :  { %v1808_v25 = vadd.f32 %v1324_v20, %v245_v24  ;;  %253 = vadd.xlane.f32.xlu0 %v1806_v22  ;;  %v1453_v26 = vpop.f32.mrb[3].mxu1  ;;  %v259_v27 = vmul.f32 %v1806_v22, %v1806_v22  ;;  %v1537_v20 = vld [vmem:[%s2146_s11 + $0x40] ss:$16 sps:$4 sm:$0xff]  }
 0x1e0   :  { %v1549_v24 = vld [vmem:[%s2146_s11 + $0x80] ss:$16 sps:$4 sm:$0xff]  }
 0x1e1   :  { %261 = vadd.xlane.f32.xlu1 %v259_v27  ;;  %v260_v28 = vmul.f32 %v1808_v25, %v1808_v25  ;;  %v1555_v26 = vld [vmem:[%s2146_s11 + $0xa0] ss:$16 sps:$4 sm:$0xff]   ;;  %v1563_v27 = vld [vmem:[%s2146_s11 + $0xc4] ss:$16 sps:$4 sm:$0xff]  }
 0x1e3   :  { %255 = vadd.xlane.f32.xlu0 %v1808_v25 }
 0x1e5   :  { %263 = vadd.xlane.f32.xlu1 %v260_v28  ;;  %v1561_v28 = vld [vmem:[%s2146_s11 + $0xc0] ss:$16 sps:$4 sm:$0xff]  }
 0x26c   :  { %v254_v33 = vpop.xlane.xlu0 %253 }
 0x26d   :  { %v257_v34 = vmul.f32 0.0078125, %v254_v33 }
 0x26e   :  { %v262_v35 = vpop.xlane.xlu1 %261 }
 0x26f   :  { %v267_v36 = vmul.f32 %v257_v34, %v257_v34  ;;  %v265_v37 = vmul.f32 0.0078125, %v262_v35 }
 0x270   :  { %v256_v38 = vpop.xlane.xlu0 %255 }
 0x271   :  { %v269_v39 = vsub.f32 %v265_v37, %v267_v36  ;;  %v258_v40 = vmul.f32 0.0078125, %v256_v38  ;;  %v1534_v37 = vld [vmem:[%s2146_s11 + $0x8] ss:$16 sps:$4 sm:$0xff]   ;;  %v1542_v38 = vld [vmem:[%s2146_s11 + $0x2c] ss:$16 sps:$4 sm:$0xff]  }
 0x272   :  { %v264_v41 = vpop.xlane.xlu1 %263 }
 0x273   :  { %v271_v42 = vmax.f32 %v269_v39, 0.0  ;;  %v268_v43 = vmul.f32 %v258_v40, %v258_v40  ;;  %v266_v44 = vmul.f32 0.0078125, %v264_v41  ;;  %v1540_v39 = vld [vmem:[%s2146_s11 + $0x28] ss:$16 sps:$4 sm:$0xff]  }
 0x274   :  { %v1546_v41 = vld [vmem:[%s2146_s11 + $0x48] ss:$16 sps:$4 sm:$0xff]  }
 0x275   :  { %v273_v45 = vadd.f32 1e-05, %v271_v42  ;;  %v270_v46 = vsub.f32 %v266_v44, %v268_v43  ;;  %v1552_v42 = vld [vmem:[%s2146_s11 + $0x68] ss:$16 sps:$4 sm:$0xff]   ;;  %v1560_v43 = vld [vmem:[%s2146_s11 + $0x8c] ss:$16 sps:$4 sm:$0xff]  }
 0x276   :  { %v1558_v44 = vld [vmem:[%s2146_s11 + $0x88] ss:$16 sps:$4 sm:$0xff]  }
 0x277   :  { %1607 = vrsqrt.f32 %v273_v45  ;;  %v272_v47 = vmax.f32 %v270_v46, 0.0  ;;  %v1566_v45 = vld [vmem:[%s2146_s11 + $0xac] ss:$16 sps:$4 sm:$0xff]   ;;  %v1564_v46 = vld [vmem:[%s2146_s11 + $0xa8] ss:$16 sps:$4 sm:$0xff]  }
 0x279   :  { %v274_v48 = vadd.f32 1e-05, %v272_v47  ;;  %v1572_v47 = vld [vmem:[%s2146_s11 + $0xcc] ss:$16 sps:$4 sm:$0xff]  }
 0x27b   :  { %1609 = vrsqrt.f32 %v274_v48  ;;  %v1570_v48 = vld [vmem:[%s2146_s11 + $0xc8] ss:$16 sps:$4 sm:$0xff]  }
 0x281   :  { %v1608_v50 = vpop.eup %1607 }
 0x282   :  { %v277_v51 = vmul.f32 %v1608_v50, %v249_v49  ;;  %v544_v49 = vld [vmem:[%s2145_s10] sm:$0x1]  ;;  %v1575_v50 = vld [vmem:[%s2146_s11 + $0xec] ss:$16 sps:$4 sm:$0xff]  }
 0x284   :  { %285 = vperm.xlu0 %1505, %v277_v51   ;;  %v279_v56 = vmul.f32 %v277_v51, %v257_v34  ;;  %v1536_v34 = vld [vmem:[%s2146_s11 + $0xc] ss:$16 sps:$4 sm:$0xff]   ;;  %v1573_v51 = vld [vmem:[%s2146_s11 + $0xe8] ss:$16 sps:$4 sm:$0xff]  }
 0x285   :  { %v1610_v54 = vpop.eup %1609 }
 0x286   :  { %v278_v55 = vmul.f32 %v1610_v54, %v250_v52  ;;  %v281_v59 = vsub.f32 %v251_v57, %v279_v56  ;;  %v1335_v52 = vld [vmem:[%s2142_s7] ss:$0 sm:$0xff] }
 0x288   :  { %290 = vperm.xlu1 %1506, %v278_v55   ;;  %v280_v60 = vmul.f32 %v278_v55, %v258_v40  ;;  %v1548_v40 = vld [vmem:[%s2146_s11 + $0x4c] ss:$16 sps:$4 sm:$0xff]  }
 0x28a   :  { %v282_v63 = vsub.f32 %v252_v61, %v280_v60 }
 0x28c   :  { %297 = vperm.xlu1 %1506, %v281_v59  }
 0x290   :  { %302 = vperm.xlu1 %1506, %v282_v63  }
 0x303   :  { %v286_v3 = vpop.permute.xlu0 %285 }
 0x304   :  { %v293_v5 = vmul.f32 %v286_v3, %v1806_v22  ;;  %v1543_v22 = vld [vmem:[%s2146_s11 + $0x60] ss:$16 sps:$4 sm:$0xff]  }
 0x305   :  { %v1577_v3 = vld [vmem:[%s2148_s13] sm:$0xff]  }
 0x307   :  { %v291_v2 = vpop.permute.xlu1 %290 }
 0x308   :  { %v294_v6 = vmul.f32 %v291_v2, %v1808_v25  ;;  %v1557_v25 = vld [vmem:[%s2146_s11 + $0xa4] ss:$16 sps:$4 sm:$0xff]  }
 0x309   :  { %v1576_v2 = vld [vmem:[%s2148_s13 + $0x40] sm:$0xff]  }
 0x30b   :  { %v298_v4 = vpop.permute.xlu1 %297 }
 0x30c   :  { %v305_v7 = vadd.f32 %v298_v4, %v293_v5  ;;  %v1578_v4 = vld [vmem:[%s2148_s13 + $0x80] sm:$0xff]   ;;  %v1579_v5 = vld [vmem:[%s2148_s13 + $0x48] sm:$0xff]  }
 0x30e   :  { %v307_v10 = vmax.f32 %v305_v7, 0.0  ;;  %v1580_v7 = vld [vmem:[%s2148_s13 + $0x8] sm:$0xff]  }
 0x30f   :  { %v303_v8 = vpop.permute.xlu1 %302 }
 0x310   :  { %v306_v9 = vadd.f32 %v303_v8, %v294_v6  ;;  %v1581_v6 = vld [vmem:[%s2148_s13 + $0x88] sm:$0xff]   ;;  %v1582_v8 = vld [vmem:[%s2148_s13 + $0x50] sm:$0xff]  }
 0x312   :  { %v308_v11 = vmax.f32 %v306_v9, 0.0  ;;  %v1584_v9 = vld [vmem:[%s2148_s13 + $0x90] sm:$0xff]  }
 0x314   :  { %v309_v12 = vpack.c.bf16 %v308_v11, %v307_v10  ;;  %v1583_v10 = vld [vmem:[%s2148_s13 + $0x10] sm:$0xff]   ;;  %v1585_v11 = vld [vmem:[%s2148_s13 + $0x58] sm:$0xff]  }
 0x316   :  { %1471 = vmatmul.mubr.bf16.vlgmr.msra.gmra.mrb[4].mxu1 %v309_v12  ;;  %v1587_v12 = vld [vmem:[%s2148_s13 + $0x98] sm:$0xff]  }
 0x317   :  { %791 = vmatprep.mubr.bf16.mxu1 %v1643_v1  ;;  %760 = vmatpush1.bf16.msra.mxu1 %v1528_v14  ;;  %v1586_v14 = vld [vmem:[%s2148_s13 + $0x18] sm:$0xff]  }
 0x318   :  { %761 = vmatprep.subr.bf16.mxu1 %v1533_v16  ;;  %v579_v16 = vlaneseq }
 0x31b   :  { %762 = vmatpush1.bf16.msra.mxu1 %v1531_v17  ;;  %v1590_v17 = vld [vmem:[%s2148_s13 + $0xa0] sm:$0xff]  }
 0x31c   :  { %763 = vmatprep.subr.bf16.mxu1 %v1539_v18  ;;  %v1589_v18 = vld [vmem:[%s2148_s13 + $0x20] sm:$0xff]  }
 0x31f   :  { %764 = vmatpush1.bf16.msra.mxu1 %v1537_v20  ;;  %v1591_v20 = vld [vmem:[%s2148_s13 + $0x68] sm:$0xff]  }
 0x320   :  { %765 = vmatprep.subr.bf16.mxu1 %v1545_v21  ;;  %v580_v21 = vshrl.u32 %v579_v16, 7 }
 0x323   :  { %766 = vmatpush1.bf16.msra.mxu1 %v1543_v22  ;;  %v1593_v22 = vld [vmem:[%s2148_s13 + $0xa8] sm:$0xff]  }
 0x324   :  { %767 = vmatprep.subr.bf16.mxu1 %v1551_v23  ;;  %v1592_v23 = vld [vmem:[%s2148_s13 + $0x28] sm:$0xff]  }
 0x327   :  { %768 = vmatpush1.bf16.msra.mxu1 %v1549_v24  ;;  %v581_v24 = vsub.s32 0, %v580_v21 }
 0x328   :  { %769 = vmatprep.subr.bf16.mxu1 %v1557_v25  ;;  %v1594_v25 = vld [vmem:[%s2148_s13 + $0x70] sm:$0xff]  }
 0x32b   :  { %770 = vmatpush1.bf16.msra.mxu1 %v1555_v26  ;;  %v577_v26 = vld [vmem:[%s2147_s12] sm:$0xf] }
 0x32c   :  { %771 = vmatprep.subr.bf16.mxu1 %v1563_v27  ;;  %v585_v27 = vsub.s32 1, %v580_v21 }
 0x32f   :  { %772 = vmatpush1.bf16.msra.mxu1 %v1561_v28  ;;  %v1596_v28 = vld [vmem:[%s2148_s13 + $0xb0] sm:$0xff]  }
 0x330   :  { %773 = vmatprep.subr.bf16.mxu1 %v1569_v29  ;;  %v1595_v29 = vld [vmem:[%s2148_s13 + $0x30] sm:$0xff]  }
 0x333   :  { %774 = vmatpush1.bf16.msra.mxu1 %v1567_v30  ;;  %v582_v30 = vrot.slane %v577_v26, %v581_v24  ;;  %v467_v24 = vld [vmem:[%s2144_s9 + $0x8] sm:$0xff] }
 0x334   :  { %1418 = vmatprep.subr.bf16.mxu1 %v1576_v2 }
 0x336   :  { %792 = vmatmul.mubr.bf16.vlgmr.msra.gmra.mrb[8].mxu1 %v544_v49 }
 0x337   :  { %1419 = vmatpush3.bf16.msra.mxu1 %v1577_v3 }
 0x338   :  { %1420 = vmatprep.subr.bf16.mxu1 %v1579_v5 }
 0x33b   :  { %1421 = vmatpush3.bf16.msra.mxu1 %v1580_v7 }
 0x33c   :  { %1422 = vmatprep.subr.bf16.mxu1 %v1582_v8 }
 0x33f   :  { %1423 = vmatpush3.bf16.msra.mxu1 %v1583_v10 }
 0x340   :  { %1424 = vmatprep.subr.bf16.mxu1 %v1585_v11 }
 0x343   :  { %1425 = vmatpush3.bf16.msra.mxu1 %v1586_v14  ;;  %v464_v14 = vld [vmem:[%s2143_s8] sm:$0xff] }
 0x344   :  { %1426 = vmatprep.subr.bf16.mxu1 %v1588_v15 }
 0x347   :  { %1427 = vmatpush3.bf16.msra.mxu1 %v1589_v18  ;;  %v465_v18 = vld [vmem:[%s2143_s8 + $0x8] sm:$0xff] }
 0x348   :  { %1428 = vmatprep.subr.bf16.mxu1 %v1591_v20 }
 0x34b   :  { %1429 = vmatpush3.bf16.msra.mxu1 %v1592_v23 }
 0x34c   :  { %1430 = vmatprep.subr.bf16.mxu1 %v1594_v25 }
 0x34f   :  { %1431 = vmatpush3.bf16.msra.mxu1 %v1595_v29  ;;  %v1602_v29 = vld [vmem:[%s2151_s16 + $0x8] sm:$0xff]  }
 0x3e9   :  { %v408_v31 = vpop.f32.mrb[4].mxu1 }
 0x3ea   :  { %v1472_v32 = vpop.f32.mrb[5].mxu1 }
 0x3eb   :  { %v411_v33 = vpop.f32.mrb[6].mxu1  ;;  %v586_v32 = vrot.slane %v577_v26, %v585_v27  ;;  %v1601_v27 = vld [vmem:[%s2151_s16] sm:$0xff]  }
 0x3ec   :  { %v415_v35 = vpack.c.bf16 %v411_v33, %v408_v31  ;;  %v1473_v36 = vpop.f32.mrb[7].mxu1  ;;  %v1597_v31 = vld [vmem:[%s2148_s13 + $0x78] sm:$0xff]   ;;  %v589_v33 = vsub.s32 2, %v580_v21 }
 0x3ed   :  { %1432 = vmatprep.subr.bf16.mxu1 %v1597_v31 }
 0x3ee   :  { %1475 = vmatpush3.bf16.msra.mxu0 %v415_v35  ;;  %v1599_v35 = vld [vmem:[%s2148_s13 + $0xb8] sm:$0xff]  }
 0x3ef   :  { %800 = vmatprep.subr.bf16.mxu0 %v1536_v34  ;;  %v593_v34 = vsub.s32 3, %v580_v21 }
 0x3f1   :  { %1477 = vmatmul.mubr.msk.bf16.vlgmr.msra.gmra.mrb[4].mxu0 %vm204_vm3, %v1796_v19  ;;  %v1554_v19 = vld [vmem:[%s2146_s11 + $0x6c] ss:$16 sps:$4 sm:$0xff]  }
 0x3f2   :  { %801 = vmatpush1.bf16.msra.mxu0 %v1534_v37  ;;  %832 = vmatprep.mubr.bf16.mxu0 %v1643_v1  ;;  %v1598_v37 = vld [vmem:[%s2148_s13 + $0x38] sm:$0xff]  }
 0x3f3   :  { %802 = vmatprep.subr.bf16.mxu0 %v1542_v38  ;;  %1433 = vmatpush3.bf16.msra.mxu1 %v1598_v37 }
 0x3f4   :  { %1480 = vmatprep.subr.bf16.mxu1 %v1644_v13 }
 0x3f6   :  { %803 = vmatpush1.bf16.msra.mxu0 %v1540_v39 }
 0x3f7   :  { %804 = vmatprep.subr.bf16.mxu0 %v1548_v40 }
 0x3fa   :  { %805 = vmatpush1.bf16.msra.mxu0 %v1546_v41 }
 0x3fb   :  { %806 = vmatprep.subr.bf16.mxu0 %v1554_v19  ;;  %v590_v19 = vrot.slane %v577_v26, %v589_v33 }
 0x3fe   :  { %807 = vmatpush1.bf16.msra.mxu0 %v1552_v42 }
 0x3ff   :  { %808 = vmatprep.subr.bf16.mxu0 %v1560_v43 }
 0x402   :  { %809 = vmatpush1.bf16.msra.mxu0 %v1558_v44  ;;  %v594_v44 = vrot.slane %v577_v26, %v593_v34  ;;  %v1369_v34 = vld [vmem:[%s2149_s14] ss:$0 sm:$0xff] }
 0x403   :  { %810 = vmatprep.subr.bf16.mxu0 %v1566_v45  ;;  %v1600_v45 = vld [vmem:[%s2148_s13 + $0xc0] sm:$0xff]  }
 0x406   :  { %811 = vmatpush1.bf16.msra.mxu0 %v1564_v46 }
 0x407   :  { %812 = vmatprep.subr.bf16.mxu0 %v1572_v47 }
 0x409   :  { %v793_v36 = vpop.f32.mrb[8].mxu1 }
 0x40a   :  { %813 = vmatpush1.bf16.msra.mxu0 %v1570_v48  ;;  %v794_v38 = vadd.f32 %v793_v36, %v582_v30  ;;  %v795_v39 = vpop.f32.mrb[9].mxu1  ;;  %v1603_v30 = vld [vmem:[%s2151_s16 + $0x10] sm:$0xff]  }
 0x40b   :  { %814 = vmatprep.subr.bf16.mxu0 %v1575_v50  ;;  %v796_v40 = vadd.f32 %v795_v39, %v586_v32  ;;  %v797_v41 = vpop.f32.mrb[10].mxu1 }
 0x40c   :  { %v841_v42 = vmax.f32 %v794_v38, 0.0  ;;  %v798_v43 = vpop.f32.mrb[11].mxu1 }
 0x40d   :  { %v842_v46 = vmax.f32 %v796_v40, 0.0 }
 0x40e   :  { %815 = vmatpush1.bf16.msra.mxu0 %v1573_v51  ;;  %v845_v47 = vpack.c.bf16 %v841_v42, %v841_v42 }
 0x40f   :  { %1099 = vmatprep.subr.bf16.mxu0 %v1643_v1 }
 0x411   :  { %833 = vmatmul.mubr.bf16.vlgmr.msra.gmra.mrb[8].mxu0 %v544_v49  ;;  %v846_v49 = vpack.c.bf16 %v842_v46, %v842_v46  ;;  %v1605_v46 = vld [vmem:[%s2151_s16 + $0x18] sm:$0xff]   ;;  %s1646_s16 = smov 96  }
 0x412   :  { %1100 = vmatpush1.bf16.msra.mxu0 %v1578_v4 }
 0x413   :  { %1101 = vmatprep.subr.bf16.mxu0 %v1643_v1  ;;  %1091 = vmatprep.mubr.bf16.mxu1 %v846_v49 }
 0x414   :  { %1092 = vmatmul.mubr.bf16.vlgmr.msra.gmra.mrb[12].mxu1 %v845_v47 }
 0x415   :  { %1488 = vmatprep.mubr.msk.bf16.mxu1 %vm1645_vm2, %v1644_v13  ;;  %1481 = vmatpush3.bf16.msra.mxu1 %v1601_v27 }
 0x416   :  { %1102 = vmatpush1.bf16.msra.mxu0 %v1581_v6  ;;  %1482 = vmatprep.subr.bf16.mxu1 %v1644_v13 }
 0x417   :  { %1103 = vmatprep.subr.bf16.mxu0 %v1643_v1 }
 0x419   :  { %1483 = vmatpush3.bf16.msra.mxu1 %v1602_v29 }
 0x41a   :  { %1104 = vmatpush1.bf16.msra.mxu0 %v1584_v9  ;;  %1484 = vmatprep.subr.bf16.mxu1 %v1644_v13 }
 0x41b   :  { %1105 = vmatprep.subr.bf16.mxu0 %v1643_v1 }
 0x41d   :  { %1485 = vmatpush3.bf16.msra.mxu1 %v1603_v30 }
 0x41e   :  { %1106 = vmatpush1.bf16.msra.mxu0 %v1587_v12  ;;  %1486 = vmatprep.subr.bf16.mxu1 %v1644_v13 }
 0x41f   :  { %1107 = vmatprep.subr.bf16.mxu0 %v1643_v1 }
 0x421   :  { %1487 = vmatpush3.bf16.msra.mxu1 %v1605_v46 }
 0x422   :  { %1108 = vmatpush1.bf16.msra.mxu0 %v1590_v17  ;;  %v466_v17 = vld [vmem:[%s2144_s9] sm:$0xff] }
 0x423   :  { %1109 = vmatprep.subr.bf16.mxu0 %v1643_v1 }
 0x426   :  { %1110 = vmatpush1.bf16.msra.mxu0 %v1593_v22 }
 0x427   :  { %1111 = vmatprep.subr.bf16.mxu0 %v1643_v1 }
 0x42a   :  { %1112 = vmatpush1.bf16.msra.mxu0 %v1596_v28  ;;  %v1604_v28 = vld [vmem:[%s2150_s15] sm:$0xff]  }
 0x42b   :  { %1113 = vmatprep.subr.bf16.mxu0 %v1643_v1 }
 0x42e   :  { %1114 = vmatpush1.bf16.msra.mxu0 %v1599_v35 }
 0x42f   :  { %1115 = vmatprep.subr.bf16.mxu0 %v1643_v1 }
 0x432   :  { %1116 = vmatpush1.bf16.msra.mxu0 %v1600_v45 }
 0x433   :  { %1492 = vmatprep.subr.bf16.mxu0 %v1644_v13 }
 0x4c4   :  { %v457_v53 = vpop.f32.mrb[4].mxu0 }
 0x4c5   :  { %v1968_v54 = vadd.f32 %v1335_v52, %v457_v53  ;;  %v1478_v55 = vpop.f32.mrb[5].mxu0 }
 0x4c6   :  { %v460_v56 = vpop.f32.mrb[6].mxu0 }
 0x4c7   :  { %v469_v57 = vsel %vm468_vm4, %v1968_v54, 0.0  ;;  %v1972_v58 = vadd.f32 %v1335_v52, %v460_v56  ;;  %v1479_v59 = vpop.f32.mrb[7].mxu0  ;;  %v477_v60 = vmul.f32 %v1968_v54, %v1968_v54 }
 0x4c8   :  { %470 = vadd.xlane.f32.xlu1 %v469_v57 }
 0x4c9   :  { %v472_v61 = vsel %vm468_vm4, %v1972_v58, 0.0  ;;  %v479_v62 = vsel %vm468_vm4, %v477_v60, 0.0  ;;  %v478_v63 = vmul.f32 %v1972_v58, %v1972_v58 }
 0x4ca   :  { %473 = vadd.xlane.f32.xlu0 %v472_v61 }
 0x4cb   :  { %v482_v0 = vsel %vm468_vm4, %v478_v63, 0.0 }
 0x4cc   :  { %480 = vadd.xlane.f32.xlu1 %v479_v62 }
 0x4d0   :  { %483 = vadd.xlane.f32.xlu1 %v482_v0 }
 0x4e4   :  { %v834_v48 = vpop.f32.mrb[8].mxu0 }
 0x4e5   :  { %v835_v50 = vadd.f32 %v834_v48, %v590_v19  ;;  %v836_v51 = vpop.f32.mrb[9].mxu0 }
 0x4e6   :  { %v837_v52 = vadd.f32 %v836_v51, %v594_v44  ;;  %v838_v53 = vpop.f32.mrb[10].mxu0 }
 0x4e7   :  { %v843_v55 = vmax.f32 %v835_v50, 0.0  ;;  %v839_v56 = vpop.f32.mrb[11].mxu0  ;;  %v1434_v32 = vpop.f32.mrb[12].mxu1 }
 0x4e8   :  { %v844_v57 = vmax.f32 %v837_v52, 0.0  ;;  %v1435_v33 = vpop.f32.mrb[13].mxu1 }
 0x4e9   :  { %v847_v59 = vpack.c.bf16 %v843_v55, %v843_v55  ;;  %v1436_v35 = vadd.f32 %v1435_v33, %v1434_v32  ;;  %v1437_v36 = vpop.f32.mrb[14].mxu1 }
 0x4ea   :  { %v848_v1 = vpack.c.bf16 %v844_v57, %v844_v57  ;;  %v1438_v38 = vpop.f32.mrb[15].mxu1 }
 0x4eb   :  { %v1094_v41 = vadd.f32 %v1436_v35, %v1369_v34 }
 0x4ec   :  { %1395 = vmatprep.mubr.msk.bf16.mxu0 %vm204_vm3, %v848_v1 }
 0x4ed   :  { %1132 = vmatmul.mubr.bf16.vlgmr.msra.gmra.mrb[12].mxu0 %v847_v59 }
 0x4ee   :  { %1496 = vmatprep.mubr.msk.bf16.mxu0 %vm1645_vm2, %v1644_v13  ;;  %1493 = vmatpush3.bf16.msra.mxu0 %v1604_v28 }
 0x4ef   :  { %1494 = vmatprep.subr.bf16.mxu0 %v1644_v13 }
 0x555   :  { %v471_v60 = vpop.xlane.xlu1 %470 }
 0x556   :  { %v475_v61 = vmul.f32 0.015625, %v471_v60 }
 0x557   :  { %v474_v62 = vpop.xlane.xlu0 %473 }
 0x558   :  { %v487_v0 = vmul.f32 %v475_v61, %v475_v61  ;;  %v476_v3 = vmul.f32 0.015625, %v474_v62 }
 0x559   :  { %v481_v63 = vpop.xlane.xlu1 %480 }
 0x55a   :  { %v485_v2 = vmul.f32 0.015625, %v481_v63  ;;  %v488_v7 = vmul.f32 %v476_v3, %v476_v3 }
 0x55c   :  { %v489_v4 = vsub.f32 %v485_v2, %v487_v0 }
 0x55d   :  { %v484_v5 = vpop.xlane.xlu1 %483 }
 0x55e   :  { %v491_v6 = vmax.f32 %v489_v4, 0.0  ;;  %v486_v8 = vmul.f32 0.015625, %v484_v5 }
 0x560   :  { %v493_v9 = vadd.f32 1e-05, %v491_v6  ;;  %v490_v10 = vsub.f32 %v486_v8, %v488_v7  ;;  %v1404_v8 = vld [vmem:[%s2152_s17] ss:$0 sm:$0xff]  ;;  %s1647_s17 = smov [#allocation2]  }
 0x561   :  { %s1304_s3 = sshll.u32 %s1647_s17, 4  ;;  %s1305_s3 = int_to_ptr.vmem [resolvable:$true] %s1304_s3 }
 0x562   :  { %1611 = vrsqrt.f32 %v493_v9  ;;  %v492_v11 = vmax.f32 %v490_v10, 0.0  ;;  %s1619_s26 = scalar_lea.vmem %s1305_s3, 32  ;;  %p1624_p1 = scmp.lt.s32.totalorder %s1305_s3, %s1305_s3 }
 0x563   :  { %p1620_p0 = scmp.ne.s32.totalorder %s1305_s3, %s1619_s26  ;;  %p1625_p2 = scmp.lt.s32.totalorder %s1619_s26, %s1619_s26 }
 0x564   :  { %v494_v12 = vadd.f32 1e-05, %v492_v11 }
 0x565   :  { %p1626_p3 = por %p1625_p2, %p1624_p1 }
 0x566   :  { %1613 = vrsqrt.f32 %v494_v12 }
 0x567   :  { %p1627_p4 = pnand %p1626_p3, %p1620_p0 }
 0x56c   :  { %v1612_v15 = vpop.eup %1611 }
 0x56d   :  { %v497_v16 = vmul.f32 %v1612_v15, %v464_v14 }
 0x56f   :  { %505 = vperm.xlu1 %1506, %v497_v16   ;;  %v499_v20 = vmul.f32 %v497_v16, %v475_v61 }
 0x570   :  { %v1614_v21 = vpop.eup %1613 }
 0x571   :  { %v501_v22 = vsub.f32 %v466_v17, %v499_v20  ;;  %v498_v23 = vmul.f32 %v1614_v21, %v465_v18 }
 0x573   :  { %517 = vperm.xlu1 %1506, %v501_v22   ;;  %510 = vperm.xlu0 %1505, %v498_v23   ;;  %v500_v25 = vmul.f32 %v498_v23, %v476_v3 }
 0x575   :  { %v502_v26 = vsub.f32 %v467_v24, %v500_v25 }
 0x577   :  { %522 = vperm.xlu1 %1506, %v502_v26  }
 0x5c0   :  { %v1133_v42 = vpop.f32.mrb[12].mxu0 }
 0x5c1   :  { %v1134_v43 = vadd.f32 %v1133_v42, %v1094_v41  ;;  %v1135_v44 = vpop.f32.mrb[13].mxu0 }
 0x5c2   :  { %v1136_v45 = vpop.f32.mrb[14].mxu0 }
 0x5c3   :  { %v1139_v48 = vmax.f32 %v1134_v43, 0.0  ;;  %v1137_v49 = vpop.f32.mrb[15].mxu0 }
 0x5c5   :  { %v1145_v51 = vpack.c.bf16 %v1139_v48, %v1139_v48 }
 0x5c7   :  { %1489 = vmatmul.mubr.msk.bf16.vlgmr.msra.gmra.mrb[16].mxu1 %vm468_vm4, %v1145_v51 }
 0x5ee   :  { %v506_v31 = vpop.permute.xlu1 %505 }
 0x5ef   :  { %v513_v37 = vmul.f32 %v506_v31, %v1968_v54 }
 0x5f2   :  { %v518_v39 = vpop.permute.xlu1 %517  ;;  %v511_v40 = vpop.permute.xlu0 %510 }
 0x5f3   :  { %v525_v19 = vadd.f32 %v518_v39, %v513_v37  ;;  %v514_v13 = vmul.f32 %v511_v40, %v1972_v58  ;;  %v1606_v58 = vld [vmem:[%s2150_s15 + $0x8] sm:$0xff]  }
 0x5f4   :  { %1495 = vmatpush3.bf16.msra.mxu0 %v1606_v58 }
 0x5f5   :  { %v527_v50 = vmax.f32 %v525_v19, 0.0 }
 0x5f6   :  { %v523_v47 = vpop.permute.xlu1 %522 }
 0x5f7   :  { %v526_v54 = vadd.f32 %v523_v47, %v514_v13  ;;  %v529_v53 = vsel %vm468_vm4, %v527_v50, -inf }
 0x5f9   :  { %v528_v52 = vmax.f32 %v526_v54, 0.0 }
 0x5fb   :  { %v530_v55 = vsel %vm468_vm4, %v528_v52, -inf }
 0x5fc   :  { %v531_v56 = vmax.f32 %v529_v53, %v530_v55 }
 0x5fe   :  { %v532_v57 = vrot.slane %v531_v56, 4 }
 0x600   :  { %v533_v59 = vmax.f32 %v531_v56, %v532_v57 }
 0x602   :  { %v534_v1 = vrot.slane %v533_v59, 2 }
 0x604   :  { %v535_v60 = vmax.f32 %v533_v59, %v534_v1 }
 0x606   :  { %v536_v61 = vrot.slane %v535_v60, 1 }
 0x608   :  { %v537_v62 = vmax.f32 %v535_v60, %v536_v61 }
 0x60a   :  { %539 = vrot.lane.b32.xlu1 %v537_v62, %s1646_s16 }
 0x67c   :  { %v540_v63 = vpop.permute.xlu1 %539 }
 0x67d   :  { %v543_v0 = vsel %vm542_vm5, %v537_v62, %v540_v63 }
 0x67e   :  { %v1140_v2 = vpack.c.bf16 %v543_v0, %v543_v0 }
 0x680   :  { %1497 = vmatmul.mubr.msk.bf16.vlgmr.msra.gmra.mrb[16].mxu0 %vm1233_vm6, %v1140_v2 }
 0x69a   :  { %v1215_v3 = vpop.f32.mrb[16].mxu1 }
 0x69b   :  { %v1490_v4 = vpop.f32.mrb[17].mxu1 }
 0x69c   :  { %v1218_v5 = vpop.f32.mrb[18].mxu1 }
 0x69d   :  { %v1491_v6 = vpop.f32.mrb[19].mxu1 }
 0x753   :  { %v1271_v7 = vpop.f32.mrb[16].mxu0 }
 0x754   :  { %v1272_v9 = vadd.f32 %v1271_v7, %v1215_v3  ;;  %v1498_v10 = vpop.f32.mrb[17].mxu0 }
 0x755   :  { %v1274_v11 = vpop.f32.mrb[18].mxu0 }
 0x756   :  { %v1499_v12 = vpop.f32.mrb[19].mxu0  ;;  %v1284_v14 = vadd.f32 %v1404_v8, %v1272_v9 }
 0x758   :  { %v1286_v15 = vsel %vm1285_vm7, %v1284_v14, -inf }
 0x759   :  { %1287 = vmax.xlane.f32.xlu0 %v1286_v15 }
 0x7e6   :  { %v1288_v16 = vpop.xlane.xlu0 %1287 }
 0x7e7   :  { %v1289_v17 = vsub.f32 %v1284_v14, %v1288_v16 }
 0x7e9   :  { %v1290_v18 = vmul.f32 1.442695, %v1289_v17 }
 0x7eb   :  { %1615 = vpow2.f32 %v1290_v18 }
 0x7f5   :  { %v1616_v20 = vpop.eup %1615 }
 0x7f6   :  { %v1292_v21 = vsel %vm1285_vm7, %v1616_v20, 0.0 }
 0x7f7   :  { %1293 = vadd.xlane.f32.xlu1 %v1292_v21 }
 0x884   :  { %v1294_v22 = vpop.xlane.xlu1 %1293 }
 0x885   :  { %1617 = vrcp.f32 %v1294_v22 }
 0x88f   :  { %v1618_v23 = vpop.eup %1617 }
 0x890   :  { %v1296_v24 = vmul.f32 %v1618_v23, %v1616_v20 }
 0x892   :  { %1297 = vst.msk [vmem:[#allocation2] sm:$0x3] %vm1285_vm7, %v1296_v24 }
 0x893   :  { %1630 = shalt.err (!%p1627_p4)
}
 0x894   :  { %s1631_s13 = scalar_lea.hbm %s2153_s18, 32 }
 0x895   :  { %p1632_p5 = scmp.ne.s32.totalorder %s2153_s18, %s1631_s13  ;;  %p1635_p6 = scmp.lt.u32.totalorder %s1631_s13, %s2153_s18 }
 0x897   :  { %p1637_p7 = pnand %p1635_p6, %p1632_p5 }
 0x899   :  { %1640 = shalt.err (!%p1637_p7)
}
 0x89a   :  { %1307 = dma.vmem_to_hbm [thread:$0]  %s1305_s3, 32, %s2153_s18, [#allocation3]  }
 0x89b   :  { %1641 = dma.done.wait [#allocation3], 32  }
 0x89c   :  { %1642 = vsyncadd [#allocation3], 4294967264 }
 0x89d   :  { %1311 = vsyncpa [#allocation3], 1 }

</bundles_post_ra>
